<compile_context>
chip_gen: v7x
topology: tpu7x:2x2x1
jax: 0.10.0
libtpu: 0.0.40
codegen_flags: <defaults>
</compile_context>

<pallas_src>
import functools

import jax
import jax.numpy as jnp
from jax.experimental import pallas as pl
from jax.experimental.pallas import tpu as pltpu


# dot_general dimension numbers (2-D, no batch dims):
_NT = (((1,), (1,)), ((), ()))   # contract last dims:  [m,k] x [n,k] -> [m,n]
_NN = (((1,), (0,)), ((), ()))   # standard matmul:     [m,k] x [k,n] -> [m,n]
_TN = (((0,), (0,)), ((), ()))   # contract first dims: [k,m] x [k,n] -> [m,n]


def _round_up(n, m):
    return -(-n // m) * m


def _make_kernel(bias_slices):
    """bias_slices: static tuple of (row_offset, out_features) for layers 1..5."""

    def kernel(x_ref, w1_ref, w2_ref, w3_ref, w4_ref, w5_ref, w6t_ref,
               b_ref, b6_ref, o_ref):
        # ----- Layer 1: native batch-major x tile -> feature-major activations -----
        # [out1, in] x [tb, in] (NT) -> [out1, tb]; bf16 MXU inputs, f32 accumulation.
        xb = x_ref[...].astype(jnp.bfloat16)        # cast in-kernel (VPU); no wrapper pass
        off, size = bias_slices[0]
        h = jax.lax.dot_general(w1_ref[...], xb, _NT,
                                preferred_element_type=jnp.float32)
        h = jnp.maximum(h + b_ref[off:off + size, :], 0.0)   # bias slice loaded at use site
        h = h.astype(jnp.bfloat16)

        # ----- Layers 2..5: feature-major dots; elementwise work is lane-dense -----
        mid_w_refs = (w2_ref, w3_ref, w4_ref, w5_ref)
        for li, w_ref in enumerate(mid_w_refs, start=1):
            off, size = bias_slices[li]
            a = jax.lax.dot_general(w_ref[...], h, _NN,
                                    preferred_element_type=jnp.float32)
            a = jnp.maximum(a + b_ref[off:off + size, :], 0.0)
            # Keep layer 5's output in f32: it feeds the f32 TN dot below.
            h = a.astype(jnp.bfloat16) if li < len(mid_w_refs) else a

        # ----- Layer 6: transposing dot -> batch-major logits, then sigmoid -----
        # [k, tb] x [k, out] (TN) -> [tb, out]; the layout change rides on the MXU.
        z = jax.lax.dot_general(h, w6t_ref[...], _TN,
                                preferred_element_type=jnp.float32)
        z = z + b6_ref[...]                          # [1, out] broadcasts over batch rows

        # Numerically stable sigmoid; exp + approx reciprocal both use the EUP slot.
        e = jnp.exp(-jnp.abs(z))
        r = pl.reciprocal(1.0 + e, approx=True)
        sig = jnp.where(z >= 0.0, r, e * r)
        o_ref[...] = sig.astype(o_ref.dtype)

    return kernel


@functools.partial(jax.jit, static_argnames=("batch_tile", "out_dtype"))
def autoencoder_forward(x, params, *, batch_tile=2048, out_dtype=jnp.bfloat16):
    """Forward pass of the autoencoder.

    x:      [batch, input_dim] float32, native layout (no host/wrapper reshaping).
    params: list of 6 (w, b) in PyTorch layout, w: [out_features, in_features], b: [out_features].
    Returns [batch, input_dim] in `out_dtype` (bf16 default; pass jnp.float32 for dtype parity
    with the PyTorch module at the cost of 2x output HBM traffic).
    """
    assert batch_tile % 128 == 0, "batch_tile must be a multiple of 128"
    assert len(params) == 6

    batch, in_dim = x.shape
    out_dim = params[-1][0].shape[0]

    # Adaptive batch tiling, no wrapper-side padding:
    #  * small batches: one exact block (block_shape == full array dims is always legal);
    #  * larger batches: >=2 grid steps so the "parallel" batch axis can use both v7x
    #    TensorCores; tiles are a multiple of 128 rows, capped at batch_tile.
    if batch <= 256:
        tb = batch
    else:
        tb = min(batch_tile, _round_up(pl.cdiv(batch, 2), 128))
    grid = (pl.cdiv(batch, tb),)

    # Weights: layers 1-5 as bf16 MXU inputs (f32 accumulation in-kernel); layer 6 kept f32
    # and pre-transposed to [in6, out] so the final dot is a plain TN contraction.
    ws_mid = [w.astype(jnp.bfloat16) for (w, _) in params[:5]]
    w6t = jnp.transpose(params[5][0]).astype(jnp.float32)        # [enc_dim, out_dim] (tiny)

    # Biases: layers 1-5 consolidated into one sublane-aligned [total, 1] f32 buffer
    # (sliced from the ref per layer inside the kernel); layer 6 as a [1, out_dim] row.
    offsets, sizes, chunks = [], [], []
    cursor = 0
    for (_, b) in params[:5]:
        n = b.shape[0]
        pad_n = _round_up(n, 8)
        offsets.append(cursor)
        sizes.append(n)
        chunks.append(jnp.pad(b.astype(jnp.float32), (0, pad_n - n)))
        cursor += pad_n
    bias_buf = jnp.concatenate(chunks).reshape(cursor, 1)
    b6 = params[5][1].astype(jnp.float32).reshape(1, out_dim)

    # x / out stream per batch tile; weights & biases use constant index_maps so they stay
    # VMEM-resident across all grid steps.
    in_specs = [pl.BlockSpec((tb, in_dim), lambda i: (i, 0))]
    for w in ws_mid:
        in_specs.append(pl.BlockSpec(w.shape, lambda i: (0, 0)))
    in_specs.append(pl.BlockSpec(w6t.shape, lambda i: (0, 0)))
    in_specs.append(pl.BlockSpec(bias_buf.shape, lambda i: (0, 0)))
    in_specs.append(pl.BlockSpec(b6.shape, lambda i: (0, 0)))
    out_spec = pl.BlockSpec((tb, out_dim), lambda i: (i, 0))

    flops = 2 * batch * sum(w.shape[0] * w.shape[1] for (w, _) in params)
    bytes_accessed = (x.size * x.dtype.itemsize
                      + batch * out_dim * jnp.dtype(out_dtype).itemsize
                      + sum(w.size * 2 for w in ws_mid)
                      + w6t.size * 4 + bias_buf.size * 4 + b6.size * 4)
    cost = pl.CostEstimate(flops=flops,
                           transcendentals=batch * out_dim,
                           bytes_accessed=bytes_accessed)

    kernel = _make_kernel(tuple(zip(offsets, sizes)))

    return pl.pallas_call(
        kernel,
        out_shape=jax.ShapeDtypeStruct((batch, out_dim), out_dtype),
        grid=grid,
        in_specs=in_specs,
        out_specs=out_spec,
        compiler_params=pltpu.CompilerParams(
            dimension_semantics=("parallel",),   # batch tiles shard across TCs on v7x
        ),
        cost_estimate=cost,
    )(x, *ws_mid, w6t, bias_buf, b6)


def init_params(key, input_dim, encoding_dim):
    """PyTorch-style init: w [out, in], b [out], uniform +/- 1/sqrt(fan_in)."""
    dims = [
        (input_dim, encoding_dim),
        (encoding_dim, encoding_dim // 2),
        (encoding_dim // 2, encoding_dim // 4),
        (encoding_dim // 4, encoding_dim // 2),
        (encoding_dim // 2, encoding_dim),
        (encoding_dim, input_dim),
    ]
    params = []
    for (fan_in, fan_out) in dims:
        key, kw, kb = jax.random.split(key, 3)
        bound = 1.0 / jnp.sqrt(jnp.float32(fan_in))
        w = jax.random.uniform(kw, (fan_out, fan_in), jnp.float32, -bound, bound)
        b = jax.random.uniform(kb, (fan_out,), jnp.float32, -bound, bound)
        params.append((w, b))
    return params


def reference_forward(x, params):
    """Pure-JAX f32 reference matching the PyTorch module."""
    h = x
    for i, (w, b) in enumerate(params):
        h = h @ w.T + b
        if i < len(params) - 1:
            h = jnp.maximum(h, 0.0)
    return jax.nn.sigmoid(h)


if __name__ == "__main__":
    input_dim = 16
    encoding_dim = 32
    batch = 8

    key = jax.random.PRNGKey(0)
    key, kx, kx2 = jax.random.split(key, 3)
    params = init_params(key, input_dim, encoding_dim)

    # Small batch: single exact block, grid=(1,).
    x = jax.random.normal(kx, (batch, input_dim), jnp.float32)
    out = jax.block_until_ready(autoencoder_forward(x, params))
    ref = reference_forward(x, params)
    assert out.shape == (batch, input_dim)
    assert out.dtype == jnp.bfloat16
    # bf16 MXU inputs / bf16 output with f32 accumulation: small abs error on [0,1] outputs.
    assert jnp.allclose(out.astype(jnp.float32), ref, atol=2e-2, rtol=0.0), "mismatch (batch=8)"

    # Larger batch: exercises the multi-step streaming grid (tb=256, grid=(2,)).
    x2 = jax.random.normal(kx2, (512, input_dim), jnp.float32)
    out2 = jax.block_until_ready(autoencoder_forward(x2, params))
    ref2 = reference_forward(x2, params)
    assert out2.shape == (512, input_dim)
    assert jnp.allclose(out2.astype(jnp.float32), ref2, atol=2e-2, rtol=0.0), "mismatch (batch=512)"

    print("KERNEL_OK")
</pallas_src>

<mosaic_0001>
module attributes {stable_mosaic.version = 11 : i64} {
  func.func @kernel(%arg0: i32, %arg1: memref<8x16xf32, #tpu.memory_space<vmem>>, %arg2: memref<32x16xbf16, #tpu.memory_space<vmem>>, %arg3: memref<16x32xbf16, #tpu.memory_space<vmem>>, %arg4: memref<8x16xbf16, #tpu.memory_space<vmem>>, %arg5: memref<16x8xbf16, #tpu.memory_space<vmem>>, %arg6: memref<32x16xbf16, #tpu.memory_space<vmem>>, %arg7: memref<32x16xf32, #tpu.memory_space<vmem>>, %arg8: memref<104x1xf32, #tpu.memory_space<vmem>>, %arg9: memref<1x16xf32, #tpu.memory_space<vmem>>, %arg10: memref<8x16xbf16, #tpu.memory_space<vmem>>) attributes {dimension_semantics = [#tpu.dimension_semantics<parallel>], iteration_bounds = array<i64: 1>, scalar_prefetch = 0 : i64, scratch_operands = 0 : i64, tpu.core_type = #tpu.core_type<tc>, window_params = [{transform_indices = @transform_0, window_bounds = array<i64: 8, 16>}, {pipeline_mode = #tpu.pipeline_mode<synchronous>, transform_indices = @transform_1, window_bounds = array<i64: 32, 16>}, {pipeline_mode = #tpu.pipeline_mode<synchronous>, transform_indices = @transform_2, window_bounds = array<i64: 16, 32>}, {pipeline_mode = #tpu.pipeline_mode<synchronous>, transform_indices = @transform_3, window_bounds = array<i64: 8, 16>}, {pipeline_mode = #tpu.pipeline_mode<synchronous>, transform_indices = @transform_4, window_bounds = array<i64: 16, 8>}, {pipeline_mode = #tpu.pipeline_mode<synchronous>, transform_indices = @transform_5, window_bounds = array<i64: 32, 16>}, {pipeline_mode = #tpu.pipeline_mode<synchronous>, transform_indices = @transform_6, window_bounds = array<i64: 32, 16>}, {pipeline_mode = #tpu.pipeline_mode<synchronous>, transform_indices = @transform_7, window_bounds = array<i64: 104, 1>}, {pipeline_mode = #tpu.pipeline_mode<synchronous>, transform_indices = @transform_8, window_bounds = array<i64: 1, 16>}, {transform_indices = @transform_9, window_bounds = array<i64: 8, 16>}]} {
    %c0 = arith.constant 0 : index
    %c0_0 = arith.constant 0 : index
    %0 = vector.load %arg1[%c0, %c0_0] : memref<8x16xf32, #tpu.memory_space<vmem>>, vector<8x16xf32>
    %1 = arith.truncf %0 : vector<8x16xf32> to vector<8x16xbf16>
    %c0_1 = arith.constant 0 : index
    %c0_2 = arith.constant 0 : index
    %2 = vector.load %arg2[%c0_1, %c0_2] : memref<32x16xbf16, #tpu.memory_space<vmem>>, vector<32x16xbf16>
    %cst = arith.constant dense<0.000000e+00> : vector<32x8xf32>
    %3 = tpu.matmul %2, %1, %cst {dimension_numbers = #tpu.dot_dimension_numbers<[1], [1], [0], [0], [0, 0, 1, 0], [], []>} : vector<32x16xbf16>, vector<8x16xbf16>, vector<32x8xf32> -> vector<32x8xf32>
    %c0_3 = arith.constant 0 : index
    %c0_4 = arith.constant 0 : index
    %4 = vector.load %arg8[%c0_3, %c0_4] : memref<104x1xf32, #tpu.memory_space<vmem>>, vector<32x1xf32>
    %5 = vector.broadcast %4 : vector<32x1xf32> to vector<32x8xf32>
    %6 = arith.addf %3, %5 : vector<32x8xf32>
    %cst_5 = arith.constant 0.000000e+00 : f32
    %7 = vector.broadcast %cst_5 : f32 to vector<32x8xf32>
    %8 = arith.maximumf %6, %7 : vector<32x8xf32>
    %9 = arith.truncf %8 : vector<32x8xf32> to vector<32x8xbf16>
    %c0_6 = arith.constant 0 : index
    %c0_7 = arith.constant 0 : index
    %10 = vector.load %arg3[%c0_6, %c0_7] : memref<16x32xbf16, #tpu.memory_space<vmem>>, vector<16x32xbf16>
    %cst_8 = arith.constant dense<0.000000e+00> : vector<16x8xf32>
    %11 = tpu.matmul %10, %9, %cst_8 {dimension_numbers = #tpu.dot_dimension_numbers<[1], [0], [0], [1], [0, 0, 1, 1], [], []>} : vector<16x32xbf16>, vector<32x8xbf16>, vector<16x8xf32> -> vector<16x8xf32>
    %c32 = arith.constant 32 : index
    %c0_9 = arith.constant 0 : index
    %12 = vector.load %arg8[%c32, %c0_9] : memref<104x1xf32, #tpu.memory_space<vmem>>, vector<16x1xf32>
    %13 = vector.broadcast %12 : vector<16x1xf32> to vector<16x8xf32>
    %14 = arith.addf %11, %13 : vector<16x8xf32>
    %cst_10 = arith.constant 0.000000e+00 : f32
    %15 = vector.broadcast %cst_10 : f32 to vector<16x8xf32>
    %16 = arith.maximumf %14, %15 : vector<16x8xf32>
    %17 = arith.truncf %16 : vector<16x8xf32> to vector<16x8xbf16>
    %c0_11 = arith.constant 0 : index
    %c0_12 = arith.constant 0 : index
    %18 = vector.load %arg4[%c0_11, %c0_12] : memref<8x16xbf16, #tpu.memory_space<vmem>>, vector<8x16xbf16>
    %cst_13 = arith.constant dense<0.000000e+00> : vector<8x8xf32>
    %19 = tpu.matmul %18, %17, %cst_13 {dimension_numbers = #tpu.dot_dimension_numbers<[1], [0], [0], [1], [0, 0, 1, 1], [], []>} : vector<8x16xbf16>, vector<16x8xbf16>, vector<8x8xf32> -> vector<8x8xf32>
    %c48 = arith.constant 48 : index
    %c0_14 = arith.constant 0 : index
    %20 = vector.load %arg8[%c48, %c0_14] : memref<104x1xf32, #tpu.memory_space<vmem>>, vector<8x1xf32>
    %21 = vector.broadcast %20 : vector<8x1xf32> to vector<8x8xf32>
    %22 = arith.addf %19, %21 : vector<8x8xf32>
    %cst_15 = arith.constant 0.000000e+00 : f32
    %23 = vector.broadcast %cst_15 : f32 to vector<8x8xf32>
    %24 = arith.maximumf %22, %23 : vector<8x8xf32>
    %25 = arith.truncf %24 : vector<8x8xf32> to vector<8x8xbf16>
    %c0_16 = arith.constant 0 : index
    %c0_17 = arith.constant 0 : index
    %26 = vector.load %arg5[%c0_16, %c0_17] : memref<16x8xbf16, #tpu.memory_space<vmem>>, vector<16x8xbf16>
    %cst_18 = arith.constant dense<0.000000e+00> : vector<16x8xf32>
    %27 = tpu.matmul %26, %25, %cst_18 {dimension_numbers = #tpu.dot_dimension_numbers<[1], [0], [0], [1], [0, 0, 1, 1], [], []>} : vector<16x8xbf16>, vector<8x8xbf16>, vector<16x8xf32> -> vector<16x8xf32>
    %c56 = arith.constant 56 : index
    %c0_19 = arith.constant 0 : index
    %28 = vector.load %arg8[%c56, %c0_19] : memref<104x1xf32, #tpu.memory_space<vmem>>, vector<16x1xf32>
    %29 = vector.broadcast %28 : vector<16x1xf32> to vector<16x8xf32>
    %30 = arith.addf %27, %29 : vector<16x8xf32>
    %cst_20 = arith.constant 0.000000e+00 : f32
    %31 = vector.broadcast %cst_20 : f32 to vector<16x8xf32>
    %32 = arith.maximumf %30, %31 : vector<16x8xf32>
    %33 = arith.truncf %32 : vector<16x8xf32> to vector<16x8xbf16>
    %c0_21 = arith.constant 0 : index
    %c0_22 = arith.constant 0 : index
    %34 = vector.load %arg6[%c0_21, %c0_22] : memref<32x16xbf16, #tpu.memory_space<vmem>>, vector<32x16xbf16>
    %cst_23 = arith.constant dense<0.000000e+00> : vector<32x8xf32>
    %35 = tpu.matmul %34, %33, %cst_23 {dimension_numbers = #tpu.dot_dimension_numbers<[1], [0], [0], [1], [0, 0, 1, 1], [], []>} : vector<32x16xbf16>, vector<16x8xbf16>, vector<32x8xf32> -> vector<32x8xf32>
    %c72 = arith.constant 72 : index
    %c0_24 = arith.constant 0 : index
    %36 = vector.load %arg8[%c72, %c0_24] : memref<104x1xf32, #tpu.memory_space<vmem>>, vector<32x1xf32>
    %37 = vector.broadcast %36 : vector<32x1xf32> to vector<32x8xf32>
    %38 = arith.addf %35, %37 : vector<32x8xf32>
    %cst_25 = arith.constant 0.000000e+00 : f32
    %39 = vector.broadcast %cst_25 : f32 to vector<32x8xf32>
    %40 = arith.maximumf %38, %39 : vector<32x8xf32>
    %c0_26 = arith.constant 0 : index
    %c0_27 = arith.constant 0 : index
    %41 = vector.load %arg7[%c0_26, %c0_27] : memref<32x16xf32, #tpu.memory_space<vmem>>, vector<32x16xf32>
    %cst_28 = arith.constant dense<0.000000e+00> : vector<8x16xf32>
    %42 = tpu.matmul %40, %41, %cst_28 {dimension_numbers = #tpu.dot_dimension_numbers<[0], [0], [1], [1], [0, 1, 1, 1], [], []>} : vector<32x8xf32>, vector<32x16xf32>, vector<8x16xf32> -> vector<8x16xf32>
    %c0_29 = arith.constant 0 : index
    %c0_30 = arith.constant 0 : index
    %43 = vector.load %arg9[%c0_29, %c0_30] : memref<1x16xf32, #tpu.memory_space<vmem>>, vector<1x16xf32>
    %44 = vector.broadcast %43 : vector<1x16xf32> to vector<8x16xf32>
    %45 = arith.addf %42, %44 : vector<8x16xf32>
    %46 = math.absf %45 : vector<8x16xf32>
    %cst_31 = arith.constant 0.000000e+00 : f32
    %47 = vector.broadcast %cst_31 : f32 to vector<8x16xf32>
    %48 = arith.subf %47, %46 : vector<8x16xf32>
    %49 = math.exp %48 : vector<8x16xf32>
    %cst_32 = arith.constant 1.000000e+00 : f32
    %50 = vector.broadcast %cst_32 : f32 to vector<8x16xf32>
    %51 = arith.addf %50, %49 : vector<8x16xf32>
    %52 = tpu.reciprocal %51 {approx = true} : vector<8x16xf32> -> vector<8x16xf32>
    %cst_33 = arith.constant 0.000000e+00 : f32
    %53 = vector.broadcast %cst_33 : f32 to vector<8x16xf32>
    %54 = arith.cmpf oge, %45, %53 : vector<8x16xf32>
    %55 = arith.mulf %49, %52 : vector<8x16xf32>
    %56 = arith.select %54, %52, %55 : vector<8x16xi1>, vector<8x16xf32>
    %57 = arith.truncf %56 : vector<8x16xf32> to vector<8x16xbf16>
    %c0_34 = arith.constant 0 : index
    %c0_35 = arith.constant 0 : index
    %58 = vector.load %arg10[%c0_34, %c0_35] : memref<8x16xbf16, #tpu.memory_space<vmem>>, vector<8x16xbf16>
    tpu.vector_store %arg10[%c0_34, %c0_35], %57 {strides = array<i32>} : memref<8x16xbf16, #tpu.memory_space<vmem>>, vector<8x16xbf16>,
    return
  }
  func.func @transform_0(%arg0: i32) -> (i32, i32) {
    %c0_i32 = arith.constant 0 : i32
    %c0_i32_0 = arith.constant 0 : i32
    return %arg0, %c0_i32 : i32, i32
  }
  func.func @transform_1(%arg0: i32) -> (i32, i32) {
    %c0_i32 = arith.constant 0 : i32
    %c0_i32_0 = arith.constant 0 : i32
    %c0_i32_1 = arith.constant 0 : i32
    return %c0_i32, %c0_i32_0 : i32, i32
  }
  func.func @transform_2(%arg0: i32) -> (i32, i32) {
    %c0_i32 = arith.constant 0 : i32
    %c0_i32_0 = arith.constant 0 : i32
    %c0_i32_1 = arith.constant 0 : i32
    return %c0_i32, %c0_i32_0 : i32, i32
  }
  func.func @transform_3(%arg0: i32) -> (i32, i32) {
    %c0_i32 = arith.constant 0 : i32
    %c0_i32_0 = arith.constant 0 : i32
    %c0_i32_1 = arith.constant 0 : i32
    return %c0_i32, %c0_i32_0 : i32, i32
  }
  func.func @transform_4(%arg0: i32) -> (i32, i32) {
    %c0_i32 = arith.constant 0 : i32
    %c0_i32_0 = arith.constant 0 : i32
    %c0_i32_1 = arith.constant 0 : i32
    return %c0_i32, %c0_i32_0 : i32, i32
  }
  func.func @transform_5(%arg0: i32) -> (i32, i32) {
    %c0_i32 = arith.constant 0 : i32
    %c0_i32_0 = arith.constant 0 : i32
    %c0_i32_1 = arith.constant 0 : i32
    return %c0_i32, %c0_i32_0 : i32, i32
  }
  func.func @transform_6(%arg0: i32) -> (i32, i32) {
    %c0_i32 = arith.constant 0 : i32
    %c0_i32_0 = arith.constant 0 : i32
    %c0_i32_1 = arith.constant 0 : i32
    return %c0_i32, %c0_i32_0 : i32, i32
  }
  func.func @transform_7(%arg0: i32) -> (i32, i32) {
    %c0_i32 = arith.constant 0 : i32
    %c0_i32_0 = arith.constant 0 : i32
    %c0_i32_1 = arith.constant 0 : i32
    return %c0_i32, %c0_i32_0 : i32, i32
  }
  func.func @transform_8(%arg0: i32) -> (i32, i32) {
    %c0_i32 = arith.constant 0 : i32
    %c0_i32_0 = arith.constant 0 : i32
    %c0_i32_1 = arith.constant 0 : i32
    return %c0_i32, %c0_i32_0 : i32, i32
  }
  func.func @transform_9(%arg0: i32) -> (i32, i32) {
    %c0_i32 = arith.constant 0 : i32
    %c0_i32_0 = arith.constant 0 : i32
    return %arg0, %c0_i32 : i32, i32
  }
}

</mosaic_0001>

<bundles_post_ra>
// kernel: autoencoder_forward.1
= control target key start
LH: loop header
LB: loop body
LE: loop exit
PB: predicated region body
PF: predicated region fallthrough
CT: control target
= control target key end

     0   :  { %vm74_vm0 = vcmask 130048   ;;  %v692_v3 = vmov 0   ;;  %s850_s0 = inlined_call_operand.vmem [shape: f32[8,16], index: 0, kind: input, shape index: {}]   ;;  %s851_s1 = inlined_call_operand.vmem [shape: bf16[32,16], index: 1, kind: input, shape index: {}]   ;;  %s852_s2 = inlined_call_operand.vmem [shape: bf16[16,32], index: 2, kind: input, shape index: {}]   ;;  %s853_s3 = inlined_call_operand.vmem [shape: bf16[8,16], index: 3, kind: input, shape index: {}]   ;;  %s854_s4 = inlined_call_operand.vmem [shape: bf16[16,8], index: 4, kind: input, shape index: {}]   ;;  %s855_s5 = inlined_call_operand.vmem [shape: bf16[32,16], index: 5, kind: input, shape index: {}]   ;;  %s856_s6 = inlined_call_operand.vmem [shape: f32[32,16], index: 6, kind: input, shape index: {}]   ;;  %s857_s7 = inlined_call_operand.vmem [shape: f32[104,1], index: 7, kind: input, shape index: {}]   ;;  %s858_s8 = inlined_call_operand.vmem [shape: f32[1,16], index: 8, kind: input, shape index: {}]   ;;  %s859_s9 = inlined_call_operand.hbm [shape: bf16[8,16], index: 9, kind: output, shape index: {}]  }
   0x1   :  { %v34_v0 = vld [vmem:[%s850_s0] sm:$0xff]  ;;  %656 = vset.pattern.permute.xlu0 %v692_v3  ;;  %657 = vset.pattern.permute.xlu1 %v692_v3  ;;  %v42_v6 = vld [vmem:[%s857_s7 + $0x10] sm:$0xff]  ;;  %v41_v7 = vld [vmem:[%s857_s7 + $0x8] sm:$0xff] }
   0x2   :  { %v35_v1 = vpack.c.bf16 %v34_v0, %v34_v0  ;;  %v658_v2 = vld [vmem:[%s851_s1] sm:$0xff]   ;;  %56 = vperm.xlu1 %657, %v42_v6   ;;  %v659_v8 = vld [vmem:[%s851_s1 + $0x8] sm:$0xff]   ;;  %v43_v9 = vld [vmem:[%s857_s7 + $0x18] sm:$0xff] }
   0x3   :  { %v40_v4 = vld [vmem:[%s857_s7] sm:$0xff]  ;;  %603 = vmatprep.mubr.msk.bf16.mxu0 %vm74_vm0, %v658_v2 }
   0x4   :  { %650 = vmatprep.subr.msk.bf16.mxu0 %vm74_vm0, %v35_v1  ;;  %v82_v5 = vsel %vm74_vm0, %v35_v1, 0  ;;  %46 = vperm.xlu0 %656, %v40_v4   ;;  %v141_v10 = vld [vmem:[%s857_s7 + $0x20] sm:$0xff] }
   0x5   :  { %602 = vmatpush3.bf16.xpose.msra.mxu0 %v82_v5 }
   0x6   :  { %61 = vperm.xlu1 %657, %v43_v9  }
   0x8   :  { %51 = vperm.xlu0 %656, %v41_v7  }
   0x9   :  { %14 = vsyncpa [#allocation3], 0  ;;  %v142_v11 = vld [vmem:[%s857_s7 + $0x28] sm:$0xff]  ;;  %v207_v12 = vld [vmem:[%s857_s7 + $0x30] sm:$0xff]  ;;  %v693_v19 = vmov 0.0   ;;  %vm694_vm1 = vmmov 0  }
   0xa   :  { %150 = vperm.xlu1 %657, %v142_v11   ;;  %v260_v13 = vld [vmem:[%s857_s7 + $0x38] sm:$0xff]  ;;  %v261_v14 = vld [vmem:[%s857_s7 + $0x40] sm:$0xff]  ;;  %v333_v15 = vld [vmem:[%s857_s7 + $0x48] sm:$0xff]  ;;  %607 = vmatprep.subr.bf16.mxu1 %v693_v19  ;;  %vm158_vm2 = vcmask 261120   ;;  %vm281_vm3 = vcmask 1043456   ;;  %vm277_vm4 = vcmask 64512  }
   0xb   :  { %v334_v16 = vld [vmem:[%s857_s7 + $0x50] sm:$0xff]  ;;  %v335_v17 = vld [vmem:[%s857_s7 + $0x58] sm:$0xff]  ;;  %v336_v18 = vld [vmem:[%s857_s7 + $0x60] sm:$0xff]  ;;  %615 = vmatprep.subr.bf16.mxu0 %v693_v19  ;;  %611 = vmatprep.mubr.msk.bf16.mxu1 %vm694_vm1, %v693_v19  ;;  %s696_s30 = smov [#allocation2]   ;;  %vm552_vm6 = vcmask 125952  }
   0xc   :  { %604 = vmatmul.mubr.msk.bf16.vlgmr.msra.gmra.mrb[0].mxu0 %vm74_vm0, %v659_v8  ;;  %145 = vperm.xlu0 %656, %v141_v10   ;;  %v660_v38 = vld [vmem:[%s852_s2] sm:$0xff]   ;;  %v663_v9 = vld [vmem:[%s855_s5 + $0x8] sm:$0xff]   ;;  %s560_s10 = sshll.u32 %s696_s30, 4  ;;  %s561_s10 = int_to_ptr.vmem [resolvable:$true] %s560_s10 }
   0xd   :  { %617 = vmatprep.mubr.msk.bf16.mxu0 %vm694_vm1, %v693_v19  ;;  %v206_v50 = vld [vmem:[%s853_s3] sm:$0xf]  ;;  %v427_v11 = vld [vmem:[%s856_s6 + $0x8] sm:$0xff]  ;;  %p673_p1 = scmp.lt.s32.totalorder %s561_s10, %s561_s10 }
   0xe   :  { %264 = vperm.xlu1 %657, %v260_v13   ;;  %v661_v60 = vld [vmem:[%s854_s4] sm:$0xff]   ;;  %v695_v13 = vmov 0.0|0.0  }
   0xf   :  { %v662_v61 = vld [vmem:[%s855_s5] sm:$0xff]  }
  0x10   :  { %210 = vperm.xlu0 %656, %v207_v12   ;;  %v426_v10 = vld [vmem:[%s856_s6] sm:$0xff]  ;;  %v428_v12 = vld [vmem:[%s856_s6 + $0x10] sm:$0xff] }
  0x12   :  { %339 = vperm.xlu1 %657, %v333_v15   ;;  %v429_v15 = vld [vmem:[%s856_s6 + $0x18] sm:$0xff] }
  0x14   :  { %269 = vperm.xlu0 %656, %v261_v14   ;;  %v645_v14 = vpack.c.bf16 %v427_v11, %v426_v10 }
  0x16   :  { %349 = vperm.xlu1 %657, %v335_v17  }
  0x18   :  { %344 = vperm.xlu0 %656, %v334_v16   ;;  %v648_v16 = vpack.c.bf16 %v429_v15, %v428_v12 }
  0x1c   :  { %354 = vperm.xlu0 %656, %v336_v18  }
  0x81   :  { %v57_v20 = vpop.permute.xlu1 %56 }
  0x83   :  { %v47_v21 = vpop.permute.xlu0 %46 }
  0x85   :  { %v62_v25 = vpop.permute.xlu1 %61 }
  0x87   :  { %v52_v28 = vpop.permute.xlu0 %51 }
  0x89   :  { %v151_v43 = vpop.permute.xlu1 %150 }
  0x8b   :  { %v146_v39 = vpop.permute.xlu0 %145 }
  0x8d   :  { %v265_v62 = vpop.permute.xlu1 %264 }
  0x8f   :  { %v211_v51 = vpop.permute.xlu0 %210 }
  0x91   :  { %v340_v18 = vpop.permute.xlu1 %339 }
  0x93   :  { %v270_v2 = vpop.permute.xlu0 %269 }
  0xdf   :  { %v605_v22 = vpop.f32.mrb[0].mxu0 }
  0xe0   :  { %v127_v23 = vadd.f32 %v605_v22, %v57_v20  ;;  %v118_v24 = vpop.f32.mrb[1].mxu0  ;;  %v345_v22 = vpop.permute.xlu0 %344 }
  0xe1   :  { %v119_v26 = vadd.f32 %v118_v24, %v47_v21  ;;  %v606_v27 = vpop.f32.mrb[2].mxu0 }
  0xe2   :  { %v130_v29 = vadd.f32 %v606_v27, %v62_v25  ;;  %v121_v30 = vpop.f32.mrb[3].mxu0  ;;  %v135_v32 = vmax.f32 %v127_v23, 0.0 }
  0xe3   :  { %v122_v31 = vadd.f32 %v121_v30, %v52_v28  ;;  %v133_v34 = vmax.f32 %v119_v26, 0.0  ;;  %v350_v26 = vpop.permute.xlu1 %349 }
  0xe4   :  { %v136_v33 = vmax.f32 %v130_v29, 0.0  ;;  %v355_v29 = vpop.permute.xlu0 %354 }
  0xe5   :  { %v134_v35 = vmax.f32 %v122_v31, 0.0 }
  0xe6   :  { %v138_v36 = vpack.c.bf16 %v136_v33, %v135_v32 }
  0xe7   :  { %v137_v37 = vpack.c.bf16 %v134_v35, %v133_v34  ;;  %v581_v34 = vld [vmem:[%s858_s8] ss:$0 sm:$0xff]  ;;  %s668_s8 = scalar_lea.vmem %s561_s10, 64 }
  0xe8   :  { %p669_p0 = scmp.ne.s32.totalorder %s561_s10, %s668_s8  ;;  %p674_p2 = scmp.lt.s32.totalorder %s668_s8, %s668_s8 }
  0xe9   :  { %608 = vmatpush3.bf16.msra.mxu1 %v137_v37 }
  0xea   :  { %609 = vmatprep.subr.bf16.mxu1 %v693_v19  ;;  %p675_p3 = por %p674_p2, %p673_p1 }
  0xec   :  { %p676_p4 = pnand %p675_p3, %p669_p0 }
  0xed   :  { %610 = vmatpush3.bf16.msra.mxu1 %v138_v36 }
  0xee   :  { %621 = vmatprep.subr.bf16.mxu1 %v693_v19 }
  0xf0   :  { %612 = vmatmul.mubr.msk.bf16.vlgmr.msra.gmra.mrb[0].mxu1 %vm158_vm2, %v660_v38 }
  0xf1   :  { %623 = vmatprep.mubr.msk.bf16.mxu1 %vm694_vm1, %v693_v19 }
 0x1c3   :  { %v196_v40 = vpop.f32.mrb[0].mxu1 }
 0x1c4   :  { %v197_v41 = vadd.f32 %v196_v40, %v146_v39  ;;  %v613_v42 = vpop.f32.mrb[1].mxu1 }
 0x1c5   :  { %v199_v44 = vpop.f32.mrb[2].mxu1 }
 0x1c6   :  { %v200_v45 = vadd.f32 %v199_v44, %v151_v43  ;;  %v614_v46 = vpop.f32.mrb[3].mxu1  ;;  %v203_v47 = vmax.f32 %v197_v41, 0.0 }
 0x1c8   :  { %v204_v48 = vmax.f32 %v200_v45, 0.0 }
 0x1ca   :  { %v205_v49 = vpack.c.bf16 %v204_v48, %v203_v47 }
 0x1cc   :  { %616 = vmatpush3.bf16.msra.mxu0 %v205_v49 }
 0x1cf   :  { %618 = vmatmul.mubr.msk.bf16.vlgmr.msra.gmra.mrb[4].mxu0 %vm74_vm0, %v206_v50 }
 0x1d0   :  { %629 = vmatprep.mubr.msk.bf16.mxu0 %vm74_vm0, %v662_v61 }
 0x2a2   :  { %v250_v52 = vpop.f32.mrb[4].mxu0 }
 0x2a3   :  { %v251_v53 = vadd.f32 %v250_v52, %v211_v51  ;;  %v619_v54 = vpop.f32.mrb[5].mxu0 }
 0x2a4   :  { %v253_v55 = vpop.f32.mrb[6].mxu0 }
 0x2a5   :  { %v256_v56 = vmax.f32 %v251_v53, 0.0  ;;  %v620_v57 = vpop.f32.mrb[7].mxu0 }
 0x2a7   :  { %v257_v58 = vpack.c.bf16 %v256_v56, %v256_v56 }
 0x2a9   :  { %v283_v59 = vsel %vm281_vm3, %v257_v58, 0 }
 0x2aa   :  { %622 = vmatpush3.bf16.msra.mxu1 %v283_v59 }
 0x2ab   :  { %644 = vmatprep.subr.bf16.mxu1 %v695_v13 }
 0x2ad   :  { %624 = vmatmul.mubr.msk.bf16.vlgmr.msra.gmra.mrb[4].mxu1 %vm277_vm4, %v661_v60 }
 0x2ae   :  { %641 = vmatprep.mubr.msk.f32.mxu1 %vm694_vm1, %v693_v19  ;;  %646 = vmatpush3.bf16.msra.mxu1 %v645_v14 }
 0x2af   :  { %647 = vmatprep.subr.bf16.mxu1 %v695_v13 }
 0x2b2   :  { %649 = vmatpush3.bf16.msra.mxu1 %v648_v16 }
 0x380   :  { %v319_v63 = vpop.f32.mrb[4].mxu1 }
 0x381   :  { %v320_v0 = vadd.f32 %v319_v63, %v265_v62  ;;  %v625_v1 = vpop.f32.mrb[5].mxu1 }
 0x382   :  { %v322_v3 = vpop.f32.mrb[6].mxu1 }
 0x383   :  { %v323_v4 = vadd.f32 %v322_v3, %v270_v2  ;;  %v626_v5 = vpop.f32.mrb[7].mxu1  ;;  %v326_v6 = vmax.f32 %v320_v0, 0.0 }
 0x385   :  { %v327_v7 = vmax.f32 %v323_v4, 0.0 }
 0x387   :  { %v328_v8 = vpack.c.bf16 %v327_v7, %v326_v6 }
 0x389   :  { %627 = vmatprep.subr.bf16.mxu0 %v328_v8 }
 0x38a   :  { %628 = vmatpush3.bf16.msra.mxu0 %v328_v8 }
 0x38d   :  { %630 = vmatmul.mubr.msk.bf16.vlgmr.msra.gmra.mrb[8].mxu0 %vm74_vm0, %v663_v9 }
 0x460   :  { %v631_v17 = vpop.f32.mrb[8].mxu0 }
 0x461   :  { %v407_v19 = vpop.f32.mrb[9].mxu0  ;;  %v416_v27 = vadd.f32 %v631_v17, %v350_v26 }
 0x462   :  { %v408_v20 = vadd.f32 %v407_v19, %v340_v18  ;;  %v632_v21 = vpop.f32.mrb[10].mxu0 }
 0x463   :  { %v410_v23 = vpop.f32.mrb[11].mxu0  ;;  %v424_v30 = vmax.f32 %v416_v27, 0.0  ;;  %v419_v31 = vadd.f32 %v632_v21, %v355_v29 }
 0x464   :  { %v422_v24 = vmax.f32 %v408_v20, 0.0  ;;  %v411_v25 = vadd.f32 %v410_v23, %v345_v22 }
 0x465   :  { %v425_v32 = vmax.f32 %v419_v31, 0.0 }
 0x466   :  { %437 = vxpose.xlu1.b32.start [1/4] (short) (narrow) %v422_v24, 8  ;;  %v423_v28 = vmax.f32 %v411_v25, 0.0 }
 0x46a   :  { %438 = vxpose.xlu1.b32.cont [2/4] (short) (narrow) %v423_v28, 8 }
 0x46e   :  { %439 = vxpose.xlu1.b32.cont [3/4] (short) (narrow) %v424_v30, 8 }
 0x472   :  { %440 = vxpose.xlu1.b32.end [4/4] (short) (narrow) %v425_v32, 8 }
 0x4e6   :  { %v453_v33 = vpop.trf.xlu1 }
 0x4e7   :  { %642 = vmatmul.mubr.msk.f32.vlgmr.msra.gmra.mrb[8].mxu1 %vm158_vm2, %v453_v33 }
 0x5ba   :  { %v538_v35 = vpop.f32.mrb[8].mxu1 }
 0x5bb   :  { %v539_v36 = vadd.f32 %v581_v34, %v538_v35  ;;  %v643_v37 = vpop.f32.mrb[9].mxu1 }
 0x5bd   :  { %v542_v38 = vand.u32 2147483647, %v539_v36  ;;  %vm548_vm5 = vcmp.ge.f32.partialorder %v539_v36, 0.0 }
 0x5bf   :  { %v543_v39 = vsub.f32 0.0, %v542_v38 }
 0x5c1   :  { %v544_v40 = vmul.f32 1.442695, %v543_v39 }
 0x5c3   :  { %664 = vpow2.f32 %v544_v40 }
 0x5cd   :  { %v665_v41 = vpop.eup %664 }
 0x5ce   :  { %v546_v42 = vadd.f32 1.0, %v665_v41 }
 0x5d0   :  { %666 = vrcp.f32 %v546_v42 }
 0x5da   :  { %v667_v43 = vpop.eup %666 }
 0x5db   :  { %v549_v44 = vmul.f32 %v667_v43, %v665_v41 }
 0x5dd   :  { %v550_v45 = vsel %vm548_vm5, %v667_v43, %v549_v44 }
 0x5de   :  { %v551_v46 = vpack.c.bf16 %v550_v45, %v550_v45 }
 0x5e0   :  { %553 = vst.msk [vmem:[#allocation2] sm:$0xf] %vm552_vm6, %v551_v46 }
 0x5e1   :  { %679 = shalt.err (!%p676_p4)
}
 0x5e2   :  { %s680_s13 = scalar_lea.hbm %s859_s9, 64 }
 0x5e3   :  { %p681_p5 = scmp.ne.s32.totalorder %s859_s9, %s680_s13  ;;  %p684_p6 = scmp.lt.u32.totalorder %s680_s13, %s859_s9 }
 0x5e5   :  { %p686_p7 = pnand %p684_p6, %p681_p5 }
 0x5e7   :  { %689 = shalt.err (!%p686_p7)
}
 0x5e8   :  { %563 = dma.vmem_to_hbm [thread:$0]  %s561_s10, 64, %s859_s9, [#allocation3]  }
 0x5e9   :  { %690 = dma.done.wait [#allocation3], 64  }
 0x5ea   :  { %691 = vsyncadd [#allocation3], 4294967232 }
 0x5eb   :  { %567 = vsyncpa [#allocation3], 1 }

</bundles_post_ra>
